<compile_context>
chip_gen: v7x
topology: tpu7x:2x2x1
jax: 0.10.0
libtpu: 0.0.40
codegen_flags: <defaults>
</compile_context>

<pallas_src>
import math

import jax
import jax.numpy as jnp
from jax.experimental import pallas as pl
from jax.experimental.pallas import tpu as pltpu


# ---------------------------------------------------------------------------
# Kernel
# ---------------------------------------------------------------------------
def _mlp_prediction_kernel(x_ref, w1_ref, b1_ref, w2_ref, b2_ref, o_ref):
    # layer1: Linear (MXU, f32 accumulation) + bias + ReLU (f32 VPU epilogue)
    h = jnp.dot(x_ref[...], w1_ref[...], preferred_element_type=jnp.float32)
    h = jnp.maximum(h + b1_ref[...], 0.0)          # (TM, H) + (1, H) broadcast

    # layer2: Linear (downcast intermediate to the weight dtype for the MXU)
    out = jnp.dot(h.astype(w2_ref.dtype), w2_ref[...],
                  preferred_element_type=jnp.float32)
    o_ref[...] = (out + b2_ref[...]).astype(o_ref.dtype)


# ---------------------------------------------------------------------------
# Wrapper
# ---------------------------------------------------------------------------
def _round_up(x, m):
    return ((x + m - 1) // m) * m


_TM_CANDIDATES = (2048, 1024, 512, 256, 128, 64, 32, 16)
_VMEM_BUDGET = 40 * 1024 * 1024  # conservative: leaves headroom on v7x (64 MiB/TC)


def _pick_batch_tile(B, D_in, H, D_out_p, cd_bytes, out_bytes):
    """Largest sublane-aligned batch tile whose working set fits the VMEM budget."""
    b_aligned = _round_up(max(B, 1), 16)
    w_bytes = (D_in * H + H * D_out_p) * cd_bytes + (H + D_out_p) * 4
    tm_eff, foot = 16, 0
    for tm in _TM_CANDIDATES:
        tm_eff = min(tm, b_aligned)
        foot = (2 * w_bytes                          # resident weights (2x: conservative)
                + 2 * tm_eff * D_in * cd_bytes       # double-buffered x tiles
                + 2 * tm_eff * D_out_p * out_bytes   # double-buffered out tiles
                + 2 * tm_eff * H * 4)                # f32 intermediate h
        if foot <= _VMEM_BUDGET:
            return tm_eff, foot
    return tm_eff, foot  # fall back to smallest candidate


def mlp_prediction(x, w1, b1, w2, b2, *, compute_dtype=jnp.bfloat16):
    """Fused 2-layer MLP forward (Linear -> ReLU -> Linear).

    x : (B, D_in)
    w1: (D_in, H),  b1: (H,) or (1, H)
    w2: (H, D_out), b2: (D_out,) or (1, D_out)
    returns (B, D_out) in x.dtype
    """
    B, D_in = x.shape
    H = w1.shape[-1]
    D_out = w2.shape[-1]
    out_dtype = x.dtype

    cd = jnp.dtype(compute_dtype)
    cd_bytes = cd.itemsize
    out_bytes = jnp.dtype(out_dtype).itemsize

    # --- lane-dense output: pad D_out up to a multiple of 128 (zeros), slice later ---
    D_out_p = _round_up(D_out, 128)
    if D_out_p != D_out:
        w2 = jnp.pad(w2.reshape(H, D_out), ((0, 0), (0, D_out_p - D_out)))
        b2 = jnp.pad(b2.reshape(1, D_out), ((0, 0), (0, D_out_p - D_out)))

    # --- dtypes: bf16 MXU inputs, f32 biases / accumulation / epilogue ---
    w1c = w1.astype(cd)
    w2c = w2.astype(cd).reshape(H, D_out_p)
    b1f = b1.astype(jnp.float32).reshape(1, H)
    b2f = b2.astype(jnp.float32).reshape(1, D_out_p)

    # --- batch tile + padding ---
    TM, footprint = _pick_batch_tile(B, D_in, H, D_out_p, cd_bytes, out_bytes)
    B_p = _round_up(B, TM)
    xc = x.astype(cd)
    if B_p != B:
        xc = jnp.pad(xc, ((0, B_p - B), (0, 0)))
    grid = (B_p // TM,)

    vmem_limit = int(min(max(footprint + (4 << 20), 16 << 20), 48 << 20))

    cost = pl.CostEstimate(
        flops=2 * B * (D_in * H + H * D_out),
        transcendentals=0,
        bytes_accessed=(B * D_in * cd_bytes
                        + (D_in * H + H * D_out_p) * cd_bytes
                        + (H + D_out_p) * 4
                        + B * D_out_p * out_bytes),
    )

    out = pl.pallas_call(
        _mlp_prediction_kernel,
        out_shape=jax.ShapeDtypeStruct((B_p, D_out_p), out_dtype),
        grid=grid,
        in_specs=[
            pl.BlockSpec((TM, D_in), lambda i: (i, 0)),        # x tile (pipelined)
            pl.BlockSpec((D_in, H), lambda i: (0, 0)),         # w1 resident
            pl.BlockSpec((1, H), lambda i: (0, 0)),            # b1 resident
            pl.BlockSpec((H, D_out_p), lambda i: (0, 0)),      # w2 resident
            pl.BlockSpec((1, D_out_p), lambda i: (0, 0)),      # b2 resident
        ],
        out_specs=pl.BlockSpec((TM, D_out_p), lambda i: (i, 0)),
        compiler_params=pltpu.CompilerParams(
            dimension_semantics=("parallel",),   # megacore on v7x, no-op on v5e/v6e
            vmem_limit_bytes=vmem_limit,
        ),
        cost_estimate=cost,
    )(xc, w1c, b1f, w2c, b2f)

    # TODO(synk): add a K-reduction grid axis for very wide input layers (D_in >~ 2K)
    # so w1 does not have to be fully resident; not needed for this head's sizes.
    return out[:B, :D_out]


# ---------------------------------------------------------------------------
# Params (mirrors torch.nn.Linear default init) + demo
# ---------------------------------------------------------------------------
def init_params(key, input_dim, output_dim=128, hidden_dim=256, dtype=jnp.float32):
    k1, k2, k3, k4 = jax.random.split(key, 4)
    bound1 = 1.0 / math.sqrt(input_dim)
    bound2 = 1.0 / math.sqrt(hidden_dim)
    w1 = jax.random.uniform(k1, (input_dim, hidden_dim), dtype, -bound1, bound1)
    b1 = jax.random.uniform(k2, (1, hidden_dim), dtype, -bound1, bound1)
    w2 = jax.random.uniform(k3, (hidden_dim, output_dim), dtype, -bound2, bound2)
    b2 = jax.random.uniform(k4, (1, output_dim), dtype, -bound2, bound2)
    return w1, b1, w2, b2


if __name__ == "__main__":
    key = jax.random.PRNGKey(0)
    kx, kp = jax.random.split(key)

    batch, input_dim, hidden_dim, output_dim = 8, 64, 256, 128
    x = jax.random.normal(kx, (batch, input_dim), jnp.float32)
    w1, b1, w2, b2 = init_params(kp, input_dim, output_dim, hidden_dim)

    out = mlp_prediction(x, w1, b1, w2, b2)
    out = jax.block_until_ready(out)
    assert out.shape == (batch, output_dim)
    assert out.dtype == x.dtype

    # Pure-JAX reference with matching bf16-input / f32-accumulate math.
    cd = jnp.bfloat16
    h_ref = jnp.dot(x.astype(cd), w1.astype(cd),
                    preferred_element_type=jnp.float32) + b1.astype(jnp.float32)
    h_ref = jnp.maximum(h_ref, 0.0)
    ref = jnp.dot(h_ref.astype(cd), w2.astype(cd),
                  preferred_element_type=jnp.float32) + b2.astype(jnp.float32)
    assert jnp.allclose(out, ref.astype(x.dtype), atol=1e-2, rtol=1e-2)

    # Also sanity-check against the full-f32 math (looser tol for bf16 MXU inputs).
    ref_f32 = jnp.maximum(x @ w1 + b1, 0.0) @ w2 + b2
    assert jnp.allclose(out, ref_f32, atol=5e-2, rtol=5e-2)

    print("KERNEL_OK")
</pallas_src>

<mosaic_0001>
module attributes {stable_mosaic.version = 11 : i64} {
  func.func @_mlp_prediction_kernel(%arg0: i32, %arg1: memref<16x64xbf16, #tpu.memory_space<vmem>>, %arg2: memref<64x256xbf16, #tpu.memory_space<vmem>>, %arg3: memref<1x256xf32, #tpu.memory_space<vmem>>, %arg4: memref<256x128xbf16, #tpu.memory_space<vmem>>, %arg5: memref<1x128xf32, #tpu.memory_space<vmem>>, %arg6: memref<16x128xf32, #tpu.memory_space<vmem>>) attributes {dimension_semantics = [#tpu.dimension_semantics<parallel>], iteration_bounds = array<i64: 1>, scalar_prefetch = 0 : i64, scratch_operands = 0 : i64, tpu.core_type = #tpu.core_type<tc>, window_params = [{transform_indices = @transform_0, window_bounds = array<i64: 16, 64>}, {pipeline_mode = #tpu.pipeline_mode<synchronous>, transform_indices = @transform_1, window_bounds = array<i64: 64, 256>}, {pipeline_mode = #tpu.pipeline_mode<synchronous>, transform_indices = @transform_2, window_bounds = array<i64: 1, 256>}, {pipeline_mode = #tpu.pipeline_mode<synchronous>, transform_indices = @transform_3, window_bounds = array<i64: 256, 128>}, {pipeline_mode = #tpu.pipeline_mode<synchronous>, transform_indices = @transform_4, window_bounds = array<i64: 1, 128>}, {transform_indices = @transform_5, window_bounds = array<i64: 16, 128>}]} {
    %c0 = arith.constant 0 : index
    %c0_0 = arith.constant 0 : index
    %0 = vector.load %arg1[%c0, %c0_0] : memref<16x64xbf16, #tpu.memory_space<vmem>>, vector<16x64xbf16>
    %c0_1 = arith.constant 0 : index
    %c0_2 = arith.constant 0 : index
    %1 = vector.load %arg2[%c0_1, %c0_2] : memref<64x256xbf16, #tpu.memory_space<vmem>>, vector<64x256xbf16>
    %cst = arith.constant dense<0.000000e+00> : vector<16x256xf32>
    %2 = tpu.matmul %0, %1, %cst {dimension_numbers = #tpu.dot_dimension_numbers<[1], [0], [0], [1], [0, 0, 1, 1], [], []>} : vector<16x64xbf16>, vector<64x256xbf16>, vector<16x256xf32> -> vector<16x256xf32>
    %c0_3 = arith.constant 0 : index
    %c0_4 = arith.constant 0 : index
    %3 = vector.load %arg3[%c0_3, %c0_4] : memref<1x256xf32, #tpu.memory_space<vmem>>, vector<1x256xf32>
    %4 = vector.broadcast %3 : vector<1x256xf32> to vector<16x256xf32>
    %5 = arith.addf %2, %4 : vector<16x256xf32>
    %cst_5 = arith.constant 0.000000e+00 : f32
    %6 = vector.broadcast %cst_5 : f32 to vector<16x256xf32>
    %7 = arith.maximumf %5, %6 : vector<16x256xf32>
    %8 = arith.truncf %7 : vector<16x256xf32> to vector<16x256xbf16>
    %c0_6 = arith.constant 0 : index
    %c0_7 = arith.constant 0 : index
    %9 = vector.load %arg4[%c0_6, %c0_7] : memref<256x128xbf16, #tpu.memory_space<vmem>>, vector<256x128xbf16>
    %cst_8 = arith.constant dense<0.000000e+00> : vector<16x128xf32>
    %10 = tpu.matmul %8, %9, %cst_8 {dimension_numbers = #tpu.dot_dimension_numbers<[1], [0], [0], [1], [0, 0, 1, 1], [], []>} : vector<16x256xbf16>, vector<256x128xbf16>, vector<16x128xf32> -> vector<16x128xf32>
    %c0_9 = arith.constant 0 : index
    %c0_10 = arith.constant 0 : index
    %11 = vector.load %arg5[%c0_9, %c0_10] : memref<1x128xf32, #tpu.memory_space<vmem>>, vector<1x128xf32>
    %12 = vector.broadcast %11 : vector<1x128xf32> to vector<16x128xf32>
    %13 = arith.addf %10, %12 : vector<16x128xf32>
    %c0_11 = arith.constant 0 : index
    %c0_12 = arith.constant 0 : index
    %14 = vector.load %arg6[%c0_11, %c0_12] : memref<16x128xf32, #tpu.memory_space<vmem>>, vector<16x128xf32>
    tpu.vector_store %arg6[%c0_11, %c0_12], %13 {strides = array<i32>} : memref<16x128xf32, #tpu.memory_space<vmem>>, vector<16x128xf32>,
    return
  }
  func.func @transform_0(%arg0: i32) -> (i32, i32) {
    %c0_i32 = arith.constant 0 : i32
    %c0_i32_0 = arith.constant 0 : i32
    return %arg0, %c0_i32 : i32, i32
  }
  func.func @transform_1(%arg0: i32) -> (i32, i32) {
    %c0_i32 = arith.constant 0 : i32
    %c0_i32_0 = arith.constant 0 : i32
    %c0_i32_1 = arith.constant 0 : i32
    return %c0_i32, %c0_i32_0 : i32, i32
  }
  func.func @transform_2(%arg0: i32) -> (i32, i32) {
    %c0_i32 = arith.constant 0 : i32
    %c0_i32_0 = arith.constant 0 : i32
    %c0_i32_1 = arith.constant 0 : i32
    return %c0_i32, %c0_i32_0 : i32, i32
  }
  func.func @transform_3(%arg0: i32) -> (i32, i32) {
    %c0_i32 = arith.constant 0 : i32
    %c0_i32_0 = arith.constant 0 : i32
    %c0_i32_1 = arith.constant 0 : i32
    return %c0_i32, %c0_i32_0 : i32, i32
  }
  func.func @transform_4(%arg0: i32) -> (i32, i32) {
    %c0_i32 = arith.constant 0 : i32
    %c0_i32_0 = arith.constant 0 : i32
    %c0_i32_1 = arith.constant 0 : i32
    return %c0_i32, %c0_i32_0 : i32, i32
  }
  func.func @transform_5(%arg0: i32) -> (i32, i32) {
    %c0_i32 = arith.constant 0 : i32
    %c0_i32_0 = arith.constant 0 : i32
    return %arg0, %c0_i32 : i32, i32
  }
}

</mosaic_0001>

<bundles_post_ra>
// kernel: tpu_custom_call.1
= control target key start
LH: loop header
LB: loop body
LE: loop exit
PB: predicated region body
PF: predicated region fallthrough
CT: control target
= control target key end

     0   :  { %10 = vsyncpa [#allocation3], 0  ;;  %s659_s0 = inlined_call_operand.hbm [shape: bf16[16,64], index: 0, kind: input, shape index: {}]   ;;  %s660_s1 = inlined_call_operand.hbm [shape: bf16[64,256], index: 1, kind: input, shape index: {}]   ;;  %s661_s2 = inlined_call_operand.vmem [shape: f32[1,256], index: 2, kind: input, shape index: {}]   ;;  %s662_s3 = inlined_call_operand.hbm [shape: bf16[256,128], index: 3, kind: input, shape index: {}]   ;;  %s663_s4 = inlined_call_operand.vmem [shape: f32[1,128], index: 4, kind: input, shape index: {}]   ;;  %s664_s5 = inlined_call_operand.hbm [shape: f32[16,128], index: 5, kind: output, shape index: {}]  }
   0x1   :  { %11 = vsyncpa [#allocation6], 0 }
   0x2   :  { %12 = vsyncpa [#allocation4], 0  ;;  %s560_s18 = smov [#allocation5]   ;;  %s466_s22 = scalar_lea.hbm %s660_s1, 1024 }
   0x3   :  { %s30_s19 = sshll.u32 %s560_s18, 4  ;;  %p467_p0 = scmp.ne.s32.totalorder %s660_s1, %s466_s22  ;;  %s31_s19 = int_to_ptr.vmem [resolvable:$true] %s30_s19 }
   0x4   :  { %p470_p1 = scmp.lt.u32.totalorder %s466_s22, %s660_s1 }
   0x6   :  { %p472_p2 = pnand %p470_p1, %p467_p0 }
   0x8   :  { %475 = shalt.err (!%p472_p2)
}
   0x9   :  { %s476_s27 = scalar_lea.vmem %s31_s19, 1024  ;;  %p481_p4 = scmp.lt.s32.totalorder %s31_s19, %s31_s19 }
   0xa   :  { %p477_p3 = scmp.ne.s32.totalorder %s31_s19, %s476_s27  ;;  %p482_p5 = scmp.lt.s32.totalorder %s476_s27, %s476_s27 }
   0xc   :  { %p483_p6 = por %p482_p5, %p481_p4 }
   0xe   :  { %p484_p7 = pnand %p483_p6, %p477_p3 }
  0x10   :  { %487 = shalt.err (!%p484_p7)
}
  0x11   :  { %s561_s28 = smov 128   ;;  %s562_s29 = smov 8  }
  0x12   :  { %36 = dma.hbm_to_vmem [thread:$0]  %s660_s1, 1024, %s31_s19, [#allocation6], %s561_s28, %s561_s28, %s562_s29  }
  0x13   :  { %s563_s7 = smov [#allocation2]   ;;  %s488_s11 = scalar_lea.hbm %s659_s0, 128 }
  0x14   :  { %s18_s8 = sshll.u32 %s563_s7, 4  ;;  %p489_p8 = scmp.ne.s32.totalorder %s659_s0, %s488_s11  ;;  %s19_s8 = int_to_ptr.vmem [resolvable:$true] %s18_s8 }
  0x15   :  { %p492_p9 = scmp.lt.u32.totalorder %s488_s11, %s659_s0 }
  0x17   :  { %p494_p10 = pnand %p492_p9, %p489_p8 }
  0x19   :  { %497 = shalt.err (!%p494_p10)
}
  0x1a   :  { %s498_s16 = scalar_lea.vmem %s19_s8, 128  ;;  %p503_p12 = scmp.lt.s32.totalorder %s19_s8, %s19_s8 }
  0x1b   :  { %p499_p11 = scmp.ne.s32.totalorder %s19_s8, %s498_s16  ;;  %p504_p13 = scmp.lt.s32.totalorder %s498_s16, %s498_s16 }
  0x1d   :  { %p505_p0 = por %p504_p13, %p503_p12 }
  0x1f   :  { %p506_p1 = pnand %p505_p0, %p499_p11 }
  0x21   :  { %509 = shalt.err (!%p506_p1)
}
  0x22   :  { %s564_s1 = smov 64   ;;  %s565_s17 = smov 4  }
  0x23   :  { %24 = dma.hbm_to_vmem [thread:$0]  %s659_s0, 128, %s19_s8, [#allocation3], %s564_s1, %s564_s1, %s565_s17  }
  0x24   :  { %s566_s20 = smov [#allocation7]   ;;  %s510_s24 = scalar_lea.hbm %s662_s3, 2048 }
  0x25   :  { %s44_s21 = sshll.u32 %s566_s20, 4  ;;  %p511_p2 = scmp.ne.s32.totalorder %s662_s3, %s510_s24  ;;  %s45_s21 = int_to_ptr.vmem [resolvable:$true] %s44_s21 }
  0x26   :  { %p514_p3 = scmp.lt.u32.totalorder %s510_s24, %s662_s3 }
  0x28   :  { %p516_p4 = pnand %p514_p3, %p511_p2 }
  0x2a   :  { %519 = shalt.err (!%p516_p4)
}
  0x2b   :  { %s520_s6 = scalar_lea.vmem %s45_s21, 2048  ;;  %p525_p6 = scmp.lt.s32.totalorder %s45_s21, %s45_s21 }
  0x2c   :  { %p521_p5 = scmp.ne.s32.totalorder %s45_s21, %s520_s6  ;;  %p526_p7 = scmp.lt.s32.totalorder %s520_s6, %s520_s6 }
  0x2e   :  { %p527_p8 = por %p526_p7, %p525_p6 }
  0x30   :  { %p528_p9 = pnand %p527_p8, %p521_p5 }
  0x32   :  { %531 = shalt.err (!%p528_p9)
}
  0x33   :  { %50 = dma.hbm_to_vmem [thread:$0]  %s662_s3, 2048, %s45_s21, [#allocation6], %s564_s1, %s564_s1, %s565_s17  }
  0x34   :  { %554 = dma.done.wait [#allocation3], 128  }
  0x35   :  { %555 = vsyncadd [#allocation3], 4294967168 }
  0x36   :  { %556 = dma.done.wait [#allocation6], 3072  }
  0x37   :  { %557 = vsyncadd [#allocation6], 4294964224  ;;  %v567_v0 = vmov 0   ;;  %v437_v1 = vld [vmem:[#allocation5 + $0x4] ss:$8 sps:$4 sm:$0xff]   ;;  %v454_v13 = vld [vmem:[#allocation7 + $0x50] sm:$0xff]   ;;  %v75_v26 = vlaneseq }
  0x38   :  { %166 = vmatprep.mubr.bf16.mxu0 %v567_v0  ;;  %v439_v2 = vld [vmem:[#allocation5] ss:$8 sps:$4 sm:$0xff]   ;;  %134 = vmatprep.subr.bf16.mxu0 %v437_v1  ;;  %v440_v3 = vld [vmem:[#allocation5 + $0x14] ss:$8 sps:$4 sm:$0xff]   ;;  %v442_v4 = vld [vmem:[#allocation5 + $0x10] ss:$8 sps:$4 sm:$0xff]  }
  0x39   :  { %135 = vmatpush1.bf16.msra.mxu0 %v439_v2  ;;  %v443_v5 = vld [vmem:[#allocation5 + $0x24] ss:$8 sps:$4 sm:$0xff]   ;;  %v445_v6 = vld [vmem:[#allocation5 + $0x20] ss:$8 sps:$4 sm:$0xff]   ;;  %v446_v7 = vld [vmem:[#allocation5 + $0x34] ss:$8 sps:$4 sm:$0xff]  }
  0x3a   :  { %136 = vmatprep.subr.bf16.mxu0 %v440_v3  ;;  %v450_v8 = vld [vmem:[#allocation7 + $0x40] sm:$0xff]   ;;  %v448_v10 = vld [vmem:[#allocation5 + $0x30] ss:$8 sps:$4 sm:$0xff]   ;;  %v452_v11 = vld [vmem:[#allocation7 + $0x48] sm:$0xff]   ;;  %vm130_vm0 = vcmask 523264   ;;  %v76_v27 = vshrl.u32 %v75_v26, 7 }
  0x3b   :  { %v451_v9 = vld [vmem:[#allocation7] sm:$0xff]   ;;  %406 = vmatprep.subr.bf16.mxu1 %v450_v8  ;;  %v453_v12 = vld [vmem:[#allocation7 + $0x8] sm:$0xff]   ;;  %v449_v14 = vld [vmem:[#allocation2] sm:$0xff]   ;;  %s568_s10 = smov [#allocation8]  }
  0x3c   :  { %407 = vmatpush3.bf16.msra.mxu1 %v451_v9  ;;  %v455_v15 = vld [vmem:[#allocation7 + $0x10] sm:$0xff]   ;;  %v456_v16 = vld [vmem:[#allocation7 + $0x58] sm:$0xff]   ;;  %v458_v18 = vld [vmem:[#allocation7 + $0x60] sm:$0xff]   ;;  %v77_v28 = vsub.s32 0, %v76_v27  ;;  %v81_v30 = vsub.s32 1, %v76_v27  ;;  %s366_s11 = sshll.u32 %s568_s10, 4  ;;  %s367_s11 = int_to_ptr.vmem [resolvable:$true] %s366_s11 }
  0x3d   :  { %137 = vmatpush1.bf16.msra.mxu0 %v442_v4  ;;  %408 = vmatprep.subr.bf16.mxu1 %v452_v11  ;;  %v457_v17 = vld [vmem:[#allocation7 + $0x18] sm:$0xff]   ;;  %v459_v19 = vld [vmem:[#allocation7 + $0x20] sm:$0xff]   ;;  %v460_v20 = vld [vmem:[#allocation7 + $0x68] sm:$0xff]   ;;  %s532_s12 = scalar_lea.vmem %s367_s11, 256  ;;  %p537_p11 = scmp.lt.s32.totalorder %s367_s11, %s367_s11 }
  0x3e   :  { %138 = vmatprep.subr.bf16.mxu0 %v443_v5  ;;  %v461_v21 = vld [vmem:[#allocation7 + $0x28] sm:$0xff]   ;;  %v462_v22 = vld [vmem:[#allocation7 + $0x70] sm:$0xff]   ;;  %v464_v24 = vld [vmem:[#allocation7 + $0x78] sm:$0xff]   ;;  %p533_p10 = scmp.ne.s32.totalorder %s367_s11, %s532_s12  ;;  %p538_p12 = scmp.lt.s32.totalorder %s532_s12, %s532_s12 }
  0x3f   :  { %v463_v23 = vld [vmem:[#allocation7 + $0x30] sm:$0xff]   ;;  %v465_v25 = vld [vmem:[#allocation7 + $0x38] sm:$0xff]  }
  0x40   :  { %409 = vmatpush3.bf16.msra.mxu1 %v453_v12  ;;  %v73_v29 = vld [vmem:[%s661_s2] sm:$0x3]  ;;  %p539_p13 = por %p538_p12, %p537_p11 }
  0x41   :  { %139 = vmatpush1.bf16.msra.mxu0 %v445_v6  ;;  %410 = vmatprep.subr.bf16.mxu1 %v454_v13  ;;  %v78_v31 = vrot.slane %v73_v29, %v77_v28  ;;  %v82_v32 = vrot.slane %v73_v29, %v81_v30  ;;  %v389_v48 = vld [vmem:[%s663_s4] ss:$0 sm:$0xff] }
  0x42   :  { %140 = vmatprep.subr.bf16.mxu0 %v446_v7  ;;  %p540_p0 = pnand %p539_p13, %p533_p10 }
  0x44   :  { %411 = vmatpush3.bf16.msra.mxu1 %v455_v15 }
  0x45   :  { %141 = vmatpush1.bf16.msra.mxu0 %v448_v10  ;;  %412 = vmatprep.subr.bf16.mxu1 %v456_v16 }
  0x48   :  { %388 = vmatmul.mubr.msk.bf16.vlgmr.msra.gmra.mrb[0].mxu0 %vm130_vm0, %v449_v14  ;;  %413 = vmatpush3.bf16.msra.mxu1 %v457_v17 }
  0x49   :  { %414 = vmatprep.subr.bf16.mxu1 %v458_v18 }
  0x4c   :  { %415 = vmatpush3.bf16.msra.mxu1 %v459_v19 }
  0x4d   :  { %416 = vmatprep.subr.bf16.mxu1 %v460_v20 }
  0x50   :  { %417 = vmatpush3.bf16.msra.mxu1 %v461_v21 }
  0x51   :  { %418 = vmatprep.subr.bf16.mxu1 %v462_v22 }
  0x54   :  { %419 = vmatpush3.bf16.msra.mxu1 %v463_v23 }
  0x55   :  { %420 = vmatprep.subr.bf16.mxu1 %v464_v24 }
  0x58   :  { %421 = vmatpush3.bf16.msra.mxu1 %v465_v25 }
 0x11b   :  { %v168_v33 = vpop.f32.mrb[0].mxu0 }
 0x11c   :  { %v169_v34 = vadd.f32 %v168_v33, %v78_v31  ;;  %v170_v35 = vpop.f32.mrb[1].mxu0 }
 0x11d   :  { %v171_v36 = vadd.f32 %v170_v35, %v82_v32  ;;  %v172_v37 = vpop.f32.mrb[2].mxu0 }
 0x11e   :  { %v173_v38 = vadd.f32 %v172_v37, %v78_v31  ;;  %v174_v39 = vpop.f32.mrb[3].mxu0  ;;  %v177_v41 = vmax.f32 %v169_v34, 0.0 }
 0x11f   :  { %v175_v40 = vadd.f32 %v174_v39, %v82_v32  ;;  %v178_v43 = vmax.f32 %v171_v36, 0.0 }
 0x120   :  { %v179_v42 = vmax.f32 %v173_v38, 0.0 }
 0x121   :  { %v180_v44 = vmax.f32 %v175_v40, 0.0 }
 0x122   :  { %v181_v45 = vpack.c.bf16 %v179_v42, %v177_v41 }
 0x123   :  { %v182_v46 = vpack.c.bf16 %v180_v44, %v178_v43 }
 0x125   :  { %350 = vmatprep.mubr.bf16.mxu1 %v182_v46 }
 0x126   :  { %351 = vmatmul.mubr.bf16.vlgmr.msra.gmra.mrb[0].mxu1 %v181_v45 }
 0x1f9   :  { %v422_v47 = vpop.f32.mrb[0].mxu1 }
 0x1fa   :  { %v423_v49 = vpop.f32.mrb[1].mxu1 }
 0x1fb   :  { %v424_v50 = vadd.f32 %v423_v49, %v422_v47  ;;  %v425_v51 = vpop.f32.mrb[2].mxu1 }
 0x1fc   :  { %v426_v52 = vpop.f32.mrb[3].mxu1 }
 0x1fd   :  { %v353_v53 = vadd.f32 %v424_v50, %v389_v48  ;;  %v427_v54 = vadd.f32 %v426_v52, %v425_v51 }
 0x1ff   :  { %359 = vst [vmem:[#allocation8] sm:$0xff] %v353_v53  ;;  %v356_v55 = vadd.f32 %v427_v54, %v389_v48 }
 0x201   :  { %360 = vst [vmem:[#allocation8 + $0x8] sm:$0xff] %v356_v55 }
 0x202   :  { %543 = shalt.err (!%p540_p0)
}
 0x203   :  { %s544_s14 = scalar_lea.hbm %s664_s5, 256 }
 0x204   :  { %p545_p1 = scmp.ne.s32.totalorder %s664_s5, %s544_s14  ;;  %p548_p2 = scmp.lt.u32.totalorder %s544_s14, %s664_s5 }
 0x206   :  { %p550_p3 = pnand %p548_p2, %p545_p1 }
 0x208   :  { %553 = shalt.err (!%p550_p3)
}
 0x209   :  { %372 = dma.vmem_to_hbm [thread:$0]  %s367_s11, 256, %s664_s5, [#allocation4], %s561_s28, %s561_s28, %s562_s29  }
 0x20a   :  { %558 = dma.done.wait [#allocation4], 256  }
 0x20b   :  { %559 = vsyncadd [#allocation4], 4294967040 }
 0x20c   :  { %376 = vsyncpa [#allocation3], 1 }
 0x20d   :  { %377 = vsyncpa [#allocation6], 1 }
 0x20e   :  { %378 = vsyncpa [#allocation4], 1 }

</bundles_post_ra>
